<compile_context>
chip_gen: v6e
topology: v6e:2x2x1
jax: 0.10.0
libtpu: 0.0.40
codegen_flags: <defaults>
</compile_context>

<pallas_src>
import functools

import jax
import jax.numpy as jnp
from jax.experimental import pallas as pl
from jax.experimental.pallas import tpu as pltpu


def _round_up(x, m):
    return (x + m - 1) // m * m


def _num_tensorcores():
    # Best effort: v7x has 2 TensorCores per chip, v5e/v6e have 1.
    try:
        kind = (getattr(jax.devices()[0], "device_kind", "") or "").lower()
        if "v7" in kind:
            return 2
    except Exception:
        pass
    return 1


def _pick_batch_tile(B):
    """One tile per TensorCore, <=256 rows, multiple of 8 (sublane)."""
    n_tc = _num_tensorcores()
    tile = pl.cdiv(B, n_tc) if n_tc > 1 else B
    tile = max(8, _round_up(tile, 8))
    return min(tile, 256)


# ----------------------------------------------------------------------------
# Pallas kernel: per (batch_tile, t) grid step
#   fc1(noisy) -> relu -> GRUCell (h carried in VMEM scratch) -> fc2(noisy)
# ----------------------------------------------------------------------------
def _noisy_rnn_rollout_kernel(
    x_ref,      # (1, TB, Fp)   bf16  input block for timestep t
    h0_ref,     # (TB, Hp)      f32   initial hidden (read at t == 0)
    w1_ref,     # (Fp, Hp)      bf16  fc1 effective weight (transposed)
    b1_ref,     # (1, Hp)       f32
    wgx_ref,    # (Hp, 4*Hp)    bf16  x-side GRU slabs [r | z | i_n | 0]
    wgh_ref,    # (Hp, 4*Hp)    bf16  h-side GRU slabs [r | z | 0 | h_n]
    bg_ref,     # (1, 4*Hp)     f32   [b_ir+b_hr | b_iz+b_hz | b_in | b_hn]
    w2_ref,     # (Hp, Ap)      bf16  fc2 effective weight (transposed)
    b2_ref,     # (1, Ap)       f32
    q_ref,      # (1, TB, Ap)   f32   q-values for timestep t
    hout_ref,   # (TB, Hp)      f32   hidden after this step (final lands in HBM)
    h_sc,       # (TB, Hp)      f32   VMEM scratch: hidden carry across t
):
    t = pl.program_id(1)
    hp = hout_ref.shape[-1]
    wt = w1_ref.dtype

    @pl.when(t == 0)
    def _():
        h_sc[...] = h0_ref[...]

    h = h_sc[...]
    x = x_ref[0]                           # (TB, Fp) bf16, no in-kernel cast

    # fc1 + relu (MXU bf16 matmul, f32 accumulate, f32 elementwise)
    a1 = jnp.dot(x, w1_ref[...], preferred_element_type=jnp.float32) + b1_ref[...]
    a1 = jnp.maximum(a1, 0.0)

    # GRU gates: two K=Hp matmuls (no concat temporary), one shared bias add.
    # Gate slabs (each Hp wide, lane-aligned):
    #   g[:, 0Hp:1Hp] = x@Wir.T + h@Whr.T + (b_ir+b_hr)
    #   g[:, 1Hp:2Hp] = x@Wiz.T + h@Whz.T + (b_iz+b_hz)
    #   g[:, 2Hp:3Hp] = x@Win.T + b_in
    #   g[:, 3Hp:4Hp] = h@Whn.T + b_hn
    g = (jnp.dot(a1.astype(wt), wgx_ref[...], preferred_element_type=jnp.float32)
         + jnp.dot(h.astype(wt), wgh_ref[...], preferred_element_type=jnp.float32)
         + bg_ref[...])

    r = jax.nn.sigmoid(g[:, 0 * hp:1 * hp])
    z = jax.nn.sigmoid(g[:, 1 * hp:2 * hp])
    n = jnp.tanh(g[:, 2 * hp:3 * hp] + r * g[:, 3 * hp:4 * hp])
    h_new = (1.0 - z) * n + z * h

    h_sc[...] = h_new
    hout_ref[...] = h_new                  # final-t value is what lands in HBM

    # fc2 (lane-dense Ap-wide output, written every step)
    q_ref[0] = (jnp.dot(h_new.astype(wt), w2_ref[...],
                        preferred_element_type=jnp.float32) + b2_ref[...])


# ----------------------------------------------------------------------------
# Rollout wrapper (padded I/O: the fast path — no per-step pad/slice glue)
# ----------------------------------------------------------------------------
@functools.partial(jax.jit, static_argnames=("batch_tile",))
def noisy_rnn_rollout_padded(x_seq_p, h0_p, packed, *, batch_tile):
    """x_seq_p: (T, Bp, Fp) bf16, h0_p: (Bp, Hp) f32 -> (T, Bp, Ap) f32, (Bp, Hp) f32."""
    T, Bp, Fp = x_seq_p.shape
    Hp = h0_p.shape[-1]
    Ap = packed["w2"].shape[-1]
    assert Bp % batch_tile == 0 and batch_tile % 8 == 0
    n_bt = Bp // batch_tile

    # VMEM budget with headroom (weights double-buffered worst-case), capped
    # below v7x's 64 MiB physical VMEM.
    act_bytes = batch_tile * (Fp * 2 + Ap * 4 + 3 * Hp * 4)
    wt_bytes = (Fp * Hp + 8 * Hp * Hp + Hp * Ap) * 2 + (5 * Hp + Ap) * 4
    vmem_limit = int(min(max(4 * (act_bytes + wt_bytes), 16 << 20), 48 << 20))

    const2 = lambda shape: pl.BlockSpec(shape, lambda i, t: (0, 0))

    q_p, h_out_p = pl.pallas_call(
        _noisy_rnn_rollout_kernel,
        out_shape=(
            jax.ShapeDtypeStruct((T, Bp, Ap), jnp.float32),
            jax.ShapeDtypeStruct((Bp, Hp), jnp.float32),
        ),
        grid_spec=pltpu.PrefetchScalarGridSpec(
            num_scalar_prefetch=0,
            grid=(n_bt, T),                                   # time innermost
            in_specs=[
                pl.BlockSpec((1, batch_tile, Fp), lambda i, t: (t, i, 0)),  # x_t
                pl.BlockSpec((batch_tile, Hp), lambda i, t: (i, 0)),        # h0
                const2((Fp, Hp)),                                           # w1
                const2((1, Hp)),                                            # b1
                const2((Hp, 4 * Hp)),                                       # wgx
                const2((Hp, 4 * Hp)),                                       # wgh
                const2((1, 4 * Hp)),                                        # bg
                const2((Hp, Ap)),                                           # w2
                const2((1, Ap)),                                            # b2
            ],
            out_specs=[
                pl.BlockSpec((1, batch_tile, Ap), lambda i, t: (t, i, 0)),  # q_t
                pl.BlockSpec((batch_tile, Hp), lambda i, t: (i, 0)),        # h_out
            ],
            scratch_shapes=[pltpu.VMEM((batch_tile, Hp), jnp.float32)],     # h carry
        ),
        # h0 (operand 1) aliases h_out (output 1): the hidden state is updated
        # in place in HBM across chained rollouts.
        input_output_aliases={1: 1},
        compiler_params=pltpu.CompilerParams(
            dimension_semantics=("parallel", "arbitrary"),
            vmem_limit_bytes=vmem_limit,
        ),
    )(
        x_seq_p, h0_p,
        packed["w1"], packed["b1"],
        packed["wgx"], packed["wgh"], packed["bg"],
        packed["w2"], packed["b2"],
    )
    return q_p, h_out_p


# ----------------------------------------------------------------------------
# Module-faithful single-step forward (unpadded I/O, like NoisyRNNAgent.forward)
# ----------------------------------------------------------------------------
@functools.partial(jax.jit, static_argnames=("n_actions", "batch_tile"))
def noisy_rnn_agent_forward(inputs, hidden_state, packed, *, n_actions,
                            batch_tile=None):
    B, F = inputs.shape
    H = packed["b1"].shape[-1]  # padded; real H recovered from hidden below
    hidden = hidden_state.reshape(B, -1)
    Hreal = hidden.shape[-1]
    Fp, Hp = packed["w1"].shape
    if batch_tile is None:
        batch_tile = _pick_batch_tile(B)
    Bp = _round_up(B, batch_tile)

    # One-step convenience path: pads here.  For rollouts use
    # noisy_rnn_rollout_padded directly (pad once per sequence).
    x_p = jnp.zeros((1, Bp, Fp), jnp.bfloat16).at[0, :B, :F].set(
        inputs.astype(jnp.bfloat16))
    h_p = jnp.zeros((Bp, Hp), jnp.float32).at[:B, :Hreal].set(hidden)

    q_p, h_out_p = noisy_rnn_rollout_padded(x_p, h_p, packed,
                                            batch_tile=batch_tile)
    return q_p[0, :B, :n_actions], h_out_p[:B, :Hreal]


# ----------------------------------------------------------------------------
# Parameters: NoisyLinear mu/sigma + GRU weights, pre-packed layout, fast
# noise-resample path (elementwise FMA in packed layout).
# ----------------------------------------------------------------------------
def make_params(key, F, H, A, sigma0=0.5):
    """Logical f32 params in PyTorch layout (weights are (out, in))."""
    k1, k2, k3 = jax.random.split(key, 3)

    def noisy_linear(k, ind, outd):
        kw, kb = jax.random.split(k)
        bound = 1.0 / jnp.sqrt(ind)
        mu_w = jax.random.uniform(kw, (outd, ind), jnp.float32, -bound, bound)
        mu_b = jax.random.uniform(kb, (outd,), jnp.float32, -bound, bound)
        sigma_w = jnp.full((outd, ind), sigma0 / jnp.sqrt(ind), jnp.float32)
        sigma_b = jnp.full((outd,), sigma0 / jnp.sqrt(ind), jnp.float32)
        return mu_w, mu_b, sigma_w, sigma_b

    f1 = noisy_linear(k1, F, H)
    f2 = noisy_linear(k3, H, A)
    kg = jax.random.split(k2, 4)
    bound = 1.0 / jnp.sqrt(H)
    u = lambda k, s: jax.random.uniform(k, s, jnp.float32, -bound, bound)
    return dict(
        fc1_mu_w=f1[0], fc1_mu_b=f1[1], fc1_sigma_w=f1[2], fc1_sigma_b=f1[3],
        fc2_mu_w=f2[0], fc2_mu_b=f2[1], fc2_sigma_w=f2[2], fc2_sigma_b=f2[3],
        w_ih=u(kg[0], (3 * H, H)), w_hh=u(kg[1], (3 * H, H)),
        b_ih=u(kg[2], (3 * H,)), b_hh=u(kg[3], (3 * H,)))


def sample_noise(key, F, H, A):
    """Factorized Gaussian noise, f(x) = sign(x)*sqrt(|x|) (NoisyLinear)."""
    f = lambda v: jnp.sign(v) * jnp.sqrt(jnp.abs(v))
    k1, k2, k3, k4 = jax.random.split(key, 4)
    return (f(jax.random.normal(k1, (F,), jnp.float32)),   # fc1 eps_in
            f(jax.random.normal(k2, (H,), jnp.float32)),   # fc1 eps_out
            f(jax.random.normal(k3, (H,), jnp.float32)),   # fc2 eps_in
            f(jax.random.normal(k4, (A,), jnp.float32)))   # fc2 eps_out


def pack_static(p, F, H, A, weight_dtype=jnp.bfloat16):
    """Noise-independent packing: padded/transposed mu & sigma for the noisy
    layers (f32) + padded gate-fused GRU weights (bf16).  Done ONCE."""
    Fp, Hp, Ap = _round_up(F, 128), _round_up(H, 128), _round_up(A, 128)
    st = {}
    st["w1_mu"] = jnp.zeros((Fp, Hp), jnp.float32).at[:F, :H].set(p["fc1_mu_w"].T)
    st["w1_sigma"] = jnp.zeros((Fp, Hp), jnp.float32).at[:F, :H].set(p["fc1_sigma_w"].T)
    st["b1_mu"] = jnp.zeros((1, Hp), jnp.float32).at[0, :H].set(p["fc1_mu_b"])
    st["b1_sigma"] = jnp.zeros((1, Hp), jnp.float32).at[0, :H].set(p["fc1_sigma_b"])
    st["w2_mu"] = jnp.zeros((Hp, Ap), jnp.float32).at[:H, :A].set(p["fc2_mu_w"].T)
    st["w2_sigma"] = jnp.zeros((Hp, Ap), jnp.float32).at[:H, :A].set(p["fc2_sigma_w"].T)
    st["b2_mu"] = jnp.zeros((1, Ap), jnp.float32).at[0, :A].set(p["fc2_mu_b"])
    st["b2_sigma"] = jnp.zeros((1, Ap), jnp.float32).at[0, :A].set(p["fc2_sigma_b"])

    def gate(w, k):  # transposed gate-k block, (H, H)
        return w[k * H:(k + 1) * H].T

    wgx = jnp.zeros((Hp, 4 * Hp), jnp.float32)
    wgx = wgx.at[:H, 0:H].set(gate(p["w_ih"], 0))                        # W_ir
    wgx = wgx.at[:H, Hp:Hp + H].set(gate(p["w_ih"], 1))                  # W_iz
    wgx = wgx.at[:H, 2 * Hp:2 * Hp + H].set(gate(p["w_ih"], 2))          # W_in
    wgh = jnp.zeros((Hp, 4 * Hp), jnp.float32)
    wgh = wgh.at[:H, 0:H].set(gate(p["w_hh"], 0))                        # W_hr
    wgh = wgh.at[:H, Hp:Hp + H].set(gate(p["w_hh"], 1))                  # W_hz
    wgh = wgh.at[:H, 3 * Hp:3 * Hp + H].set(gate(p["w_hh"], 2))          # W_hn
    st["wgx"] = wgx.astype(weight_dtype)
    st["wgh"] = wgh.astype(weight_dtype)

    bg = jnp.zeros((1, 4 * Hp), jnp.float32)
    bg = bg.at[0, 0:H].set(p["b_ih"][:H] + p["b_hh"][:H])
    bg = bg.at[0, Hp:Hp + H].set(p["b_ih"][H:2 * H] + p["b_hh"][H:2 * H])
    bg = bg.at[0, 2 * Hp:2 * Hp + H].set(p["b_ih"][2 * H:])
    bg = bg.at[0, 3 * Hp:3 * Hp + H].set(p["b_hh"][2 * H:])
    st["bg"] = bg
    return st


def apply_noise(static, eps1_in, eps1_out, eps2_in, eps2_out,
                weight_dtype=jnp.bfloat16):
    """W = mu + sigma * outer(eps) applied directly in the packed layout:
    a single elementwise FMA + cast per resample (no re-pack/transpose)."""
    Fp, Hp = static["w1_mu"].shape
    Ap = static["w2_mu"].shape[-1]
    F, H, A = eps1_in.shape[0], eps1_out.shape[0], eps2_out.shape[0]
    e1i = jnp.zeros((Fp, 1), jnp.float32).at[:F, 0].set(eps1_in)
    e1o = jnp.zeros((1, Hp), jnp.float32).at[0, :H].set(eps1_out)
    e2i = jnp.zeros((Hp, 1), jnp.float32).at[:H, 0].set(eps2_in)
    e2o = jnp.zeros((1, Ap), jnp.float32).at[0, :A].set(eps2_out)
    return dict(
        w1=(static["w1_mu"] + static["w1_sigma"] * (e1i * e1o)).astype(weight_dtype),
        b1=static["b1_mu"] + static["b1_sigma"] * e1o,
        wgx=static["wgx"], wgh=static["wgh"], bg=static["bg"],
        w2=(static["w2_mu"] + static["w2_sigma"] * (e2i * e2o)).astype(weight_dtype),
        b2=static["b2_mu"] + static["b2_sigma"] * e2o,
    )


def _assert_padding_invariant(packed, H):
    """Padded rows/cols must be exactly zero so padded hidden lanes provably
    stay zero through the GRU recurrence (guards against packing drift)."""
    Hp = packed["b1"].shape[-1]
    assert bool(jnp.all(packed["b1"][0, H:] == 0))
    assert bool(jnp.all(packed["wgx"][H:] == 0)) and bool(jnp.all(packed["wgh"][H:] == 0))
    for s in range(4):
        assert bool(jnp.all(packed["wgx"][:, s * Hp + H:(s + 1) * Hp] == 0))
        assert bool(jnp.all(packed["wgh"][:, s * Hp + H:(s + 1) * Hp] == 0))
        assert bool(jnp.all(packed["bg"][0, s * Hp + H:(s + 1) * Hp] == 0))


# ----------------------------------------------------------------------------
# Pure-JAX reference (unpadded, PyTorch-layout math; same bf16 matmul precision)
# ----------------------------------------------------------------------------
def reference_step(x, h, p, eps, mm_dtype=jnp.bfloat16):
    e1i, e1o, e2i, e2o = eps
    W1 = p["fc1_mu_w"] + p["fc1_sigma_w"] * jnp.outer(e1o, e1i)
    b1 = p["fc1_mu_b"] + p["fc1_sigma_b"] * e1o
    W2 = p["fc2_mu_w"] + p["fc2_sigma_w"] * jnp.outer(e2o, e2i)
    b2 = p["fc2_mu_b"] + p["fc2_sigma_b"] * e2o
    H = h.shape[-1]

    def mm(a, w):  # w is PyTorch (out, in)
        return jnp.dot(a.astype(mm_dtype), w.T.astype(mm_dtype),
                       preferred_element_type=jnp.float32)

    a1 = jnp.maximum(mm(x, W1) + b1, 0.0)
    gi = mm(a1, p["w_ih"]) + p["b_ih"]
    gh = mm(h, p["w_hh"]) + p["b_hh"]
    r = jax.nn.sigmoid(gi[:, :H] + gh[:, :H])
    z = jax.nn.sigmoid(gi[:, H:2 * H] + gh[:, H:2 * H])
    n = jnp.tanh(gi[:, 2 * H:] + r * gh[:, 2 * H:])
    h_new = (1.0 - z) * n + z * h
    q = mm(h_new, W2) + b2
    return q, h_new


if __name__ == "__main__":
    # Small shapes consistent with the module.
    B, T = 32, 6
    input_shape, rnn_hidden_dim, n_actions = 40, 64, 11

    key = jax.random.PRNGKey(0)
    k_p, k_eps, k_x, k_h = jax.random.split(key, 4)

    params = make_params(k_p, input_shape, rnn_hidden_dim, n_actions)
    static = pack_static(params, input_shape, rnn_hidden_dim, n_actions)
    eps = sample_noise(k_eps, input_shape, rnn_hidden_dim, n_actions)
    packed = apply_noise(static, *eps)          # one elementwise FMA per resample
    _assert_padding_invariant(packed, rnn_hidden_dim)

    x_seq = jax.random.normal(k_x, (T, B, input_shape), jnp.float32)
    h0 = jax.random.normal(k_h, (B, rnn_hidden_dim), jnp.float32)

    # Pad ONCE per sequence (bf16 inputs), keep hidden in padded f32 layout.
    batch_tile = _pick_batch_tile(B)
    Fp, Hp = static["w1_mu"].shape
    Ap = static["w2_mu"].shape[-1]
    Bp = _round_up(B, batch_tile)
    x_seq_p = jnp.zeros((T, Bp, Fp), jnp.bfloat16).at[:, :B, :input_shape].set(
        x_seq.astype(jnp.bfloat16))
    h0_p = jnp.zeros((Bp, Hp), jnp.float32).at[:B, :rnn_hidden_dim].set(h0)

    # Fused rollout: one pallas_call for the whole T-step sequence.
    q_seq_p, h_final_p = noisy_rnn_rollout_padded(x_seq_p, h0_p, packed,
                                                  batch_tile=batch_tile)
    jax.block_until_ready((q_seq_p, h_final_p))
    q_seq = q_seq_p[:, :B, :n_actions]
    h_final = h_final_p[:B, :rnn_hidden_dim]

    # Reference rollout.
    q_ref_list, h_ref = [], h0
    for t in range(T):
        q_t, h_ref = reference_step(x_seq[t], h_ref, params, eps)
        q_ref_list.append(q_t)
    q_ref = jnp.stack(q_ref_list)

    assert q_seq.shape == (T, B, n_actions) and h_final.shape == (B, rnn_hidden_dim)
    assert jnp.allclose(q_seq, q_ref, atol=2e-2, rtol=2e-2), \
        float(jnp.max(jnp.abs(q_seq - q_ref)))
    assert jnp.allclose(h_final, h_ref, atol=2e-2, rtol=2e-2), \
        float(jnp.max(jnp.abs(h_final - h_ref)))

    # Module-faithful single-step forward (NoisyRNNAgent.forward semantics).
    q1, h1 = noisy_rnn_agent_forward(x_seq[0], h0, packed, n_actions=n_actions)
    jax.block_until_ready((q1, h1))
    q1_ref, h1_ref = reference_step(x_seq[0], h0, params, eps)
    assert jnp.allclose(q1, q1_ref, atol=1e-2, rtol=1e-2), \
        float(jnp.max(jnp.abs(q1 - q1_ref)))
    assert jnp.allclose(h1, h1_ref, atol=1e-2, rtol=1e-2), \
        float(jnp.max(jnp.abs(h1 - h1_ref)))

    print("KERNEL_OK")
</pallas_src>

<mosaic_0001>
module attributes {stable_mosaic.version = 11 : i64} {
  func.func @_noisy_rnn_rollout_kernel(%arg0: i32, %arg1: i32, %arg2: memref<1x32x128xbf16, #tpu.memory_space<vmem>>, %arg3: memref<32x128xf32, #tpu.memory_space<vmem>>, %arg4: memref<128x128xbf16, #tpu.memory_space<vmem>>, %arg5: memref<1x128xf32, #tpu.memory_space<vmem>>, %arg6: memref<128x512xbf16, #tpu.memory_space<vmem>>, %arg7: memref<128x512xbf16, #tpu.memory_space<vmem>>, %arg8: memref<1x512xf32, #tpu.memory_space<vmem>>, %arg9: memref<128x128xbf16, #tpu.memory_space<vmem>>, %arg10: memref<1x128xf32, #tpu.memory_space<vmem>>, %arg11: memref<1x32x128xf32, #tpu.memory_space<vmem>>, %arg12: memref<32x128xf32, #tpu.memory_space<vmem>>, %arg13: memref<32x128xf32, #tpu.memory_space<vmem>>) attributes {dimension_semantics = [#tpu.dimension_semantics<parallel>, #tpu.dimension_semantics<arbitrary>], iteration_bounds = array<i64: 1, 6>, scalar_prefetch = 0 : i64, scratch_operands = 1 : i64, tpu.core_type = #tpu.core_type<tc>, window_params = [{transform_indices = @transform_0, window_bounds = array<i64: 1, 32, 128>}, {transform_indices = @transform_1, window_bounds = array<i64: 32, 128>}, {pipeline_mode = #tpu.pipeline_mode<synchronous>, transform_indices = @transform_2, window_bounds = array<i64: 128, 128>}, {pipeline_mode = #tpu.pipeline_mode<synchronous>, transform_indices = @transform_3, window_bounds = array<i64: 1, 128>}, {pipeline_mode = #tpu.pipeline_mode<synchronous>, transform_indices = @transform_4, window_bounds = array<i64: 128, 512>}, {pipeline_mode = #tpu.pipeline_mode<synchronous>, transform_indices = @transform_5, window_bounds = array<i64: 128, 512>}, {pipeline_mode = #tpu.pipeline_mode<synchronous>, transform_indices = @transform_6, window_bounds = array<i64: 1, 512>}, {pipeline_mode = #tpu.pipeline_mode<synchronous>, transform_indices = @transform_7, window_bounds = array<i64: 128, 128>}, {pipeline_mode = #tpu.pipeline_mode<synchronous>, transform_indices = @transform_8, window_bounds = array<i64: 1, 128>}, {transform_indices = @transform_9, window_bounds = array<i64: 1, 32, 128>}, {transform_indices = @transform_10, window_bounds = array<i64: 32, 128>}]} {
    %c0_i32 = arith.constant 0 : i32
    %0 = arith.cmpi eq, %arg1, %c0_i32 : i32
    %1 = arith.extui %0 : i1 to i32
    %c0_i32_0 = arith.constant 0 : i32
    %2 = arith.cmpi ne, %1, %c0_i32_0 : i32
    scf.if %2 {
      %c0_33 = arith.constant 0 : index
      %c0_34 = arith.constant 0 : index
      %56 = vector.load %arg3[%c0_33, %c0_34] : memref<32x128xf32, #tpu.memory_space<vmem>>, vector<32x128xf32>
      %c0_35 = arith.constant 0 : index
      %c0_36 = arith.constant 0 : index
      %57 = vector.load %arg13[%c0_35, %c0_36] : memref<32x128xf32, #tpu.memory_space<vmem>>, vector<32x128xf32>
      tpu.vector_store %arg13[%c0_35, %c0_36], %56 {strides = array<i32>} : memref<32x128xf32, #tpu.memory_space<vmem>>, vector<32x128xf32>,
    } else {
    }
    %c0 = arith.constant 0 : index
    %c0_1 = arith.constant 0 : index
    %3 = vector.load %arg13[%c0, %c0_1] : memref<32x128xf32, #tpu.memory_space<vmem>>, vector<32x128xf32>
    %c0_2 = arith.constant 0 : index
    %c0_3 = arith.constant 0 : index
    %c0_4 = arith.constant 0 : index
    %4 = vector.load %arg2[%c0_2, %c0_3, %c0_4] : memref<1x32x128xbf16, #tpu.memory_space<vmem>>, vector<1x32x128xbf16>
    %5 = vector.shape_cast %4 : vector<1x32x128xbf16> to vector<32x128xbf16>
    %c0_5 = arith.constant 0 : index
    %c0_6 = arith.constant 0 : index
    %6 = vector.load %arg4[%c0_5, %c0_6] : memref<128x128xbf16, #tpu.memory_space<vmem>>, vector<128x128xbf16>
    %cst = arith.constant dense<0.000000e+00> : vector<32x128xf32>
    %7 = tpu.matmul %5, %6, %cst {dimension_numbers = #tpu.dot_dimension_numbers<[1], [0], [0], [1], [0, 0, 1, 1], [], []>} : vector<32x128xbf16>, vector<128x128xbf16>, vector<32x128xf32> -> vector<32x128xf32>
    %c0_7 = arith.constant 0 : index
    %c0_8 = arith.constant 0 : index
    %8 = vector.load %arg5[%c0_7, %c0_8] : memref<1x128xf32, #tpu.memory_space<vmem>>, vector<1x128xf32>
    %9 = vector.broadcast %8 : vector<1x128xf32> to vector<32x128xf32>
    %10 = arith.addf %7, %9 : vector<32x128xf32>
    %cst_9 = arith.constant 0.000000e+00 : f32
    %11 = vector.broadcast %cst_9 : f32 to vector<32x128xf32>
    %12 = arith.maximumf %10, %11 : vector<32x128xf32>
    %13 = arith.truncf %12 : vector<32x128xf32> to vector<32x128xbf16>
    %c0_10 = arith.constant 0 : index
    %c0_11 = arith.constant 0 : index
    %14 = vector.load %arg6[%c0_10, %c0_11] : memref<128x512xbf16, #tpu.memory_space<vmem>>, vector<128x512xbf16>
    %cst_12 = arith.constant dense<0.000000e+00> : vector<32x512xf32>
    %15 = tpu.matmul %13, %14, %cst_12 {dimension_numbers = #tpu.dot_dimension_numbers<[1], [0], [0], [1], [0, 0, 1, 1], [], []>} : vector<32x128xbf16>, vector<128x512xbf16>, vector<32x512xf32> -> vector<32x512xf32>
    %16 = arith.truncf %3 : vector<32x128xf32> to vector<32x128xbf16>
    %c0_13 = arith.constant 0 : index
    %c0_14 = arith.constant 0 : index
    %17 = vector.load %arg7[%c0_13, %c0_14] : memref<128x512xbf16, #tpu.memory_space<vmem>>, vector<128x512xbf16>
    %cst_15 = arith.constant dense<0.000000e+00> : vector<32x512xf32>
    %18 = tpu.matmul %16, %17, %cst_15 {dimension_numbers = #tpu.dot_dimension_numbers<[1], [0], [0], [1], [0, 0, 1, 1], [], []>} : vector<32x128xbf16>, vector<128x512xbf16>, vector<32x512xf32> -> vector<32x512xf32>
    %19 = arith.addf %15, %18 : vector<32x512xf32>
    %c0_16 = arith.constant 0 : index
    %c0_17 = arith.constant 0 : index
    %20 = vector.load %arg8[%c0_16, %c0_17] : memref<1x512xf32, #tpu.memory_space<vmem>>, vector<1x512xf32>
    %21 = vector.broadcast %20 : vector<1x512xf32> to vector<32x512xf32>
    %22 = arith.addf %19, %21 : vector<32x512xf32>
    %23 = vector.extract_strided_slice %22 {offsets = [0, 0], sizes = [32, 128], strides = [1, 1]} : vector<32x512xf32> to vector<32x128xf32>
    %24 = arith.negf %23 : vector<32x128xf32>
    %25 = math.exp %24 : vector<32x128xf32>
    %cst_18 = arith.constant 1.000000e+00 : f32
    %26 = vector.broadcast %cst_18 : f32 to vector<32x128xf32>
    %27 = arith.addf %26, %25 : vector<32x128xf32>
    %28 = arith.divf %26, %27 : vector<32x128xf32>
    %29 = vector.extract_strided_slice %22 {offsets = [0, 128], sizes = [32, 128], strides = [1, 1]} : vector<32x512xf32> to vector<32x128xf32>
    %30 = arith.negf %29 : vector<32x128xf32>
    %31 = math.exp %30 : vector<32x128xf32>
    %cst_19 = arith.constant 1.000000e+00 : f32
    %32 = vector.broadcast %cst_19 : f32 to vector<32x128xf32>
    %33 = arith.addf %32, %31 : vector<32x128xf32>
    %34 = arith.divf %32, %33 : vector<32x128xf32>
    %35 = vector.extract_strided_slice %22 {offsets = [0, 256], sizes = [32, 128], strides = [1, 1]} : vector<32x512xf32> to vector<32x128xf32>
    %36 = vector.extract_strided_slice %22 {offsets = [0, 384], sizes = [32, 128], strides = [1, 1]} : vector<32x512xf32> to vector<32x128xf32>
    %37 = arith.mulf %28, %36 : vector<32x128xf32>
    %38 = arith.addf %35, %37 : vector<32x128xf32>
    %39 = math.tanh %38 : vector<32x128xf32>
    %cst_20 = arith.constant 1.000000e+00 : f32
    %40 = vector.broadcast %cst_20 : f32 to vector<32x128xf32>
    %41 = arith.subf %40, %34 : vector<32x128xf32>
    %42 = arith.mulf %41, %39 : vector<32x128xf32>
    %43 = arith.mulf %34, %3 : vector<32x128xf32>
    %44 = arith.addf %42, %43 : vector<32x128xf32>
    %c0_21 = arith.constant 0 : index
    %c0_22 = arith.constant 0 : index
    %45 = vector.load %arg13[%c0_21, %c0_22] : memref<32x128xf32, #tpu.memory_space<vmem>>, vector<32x128xf32>
    tpu.vector_store %arg13[%c0_21, %c0_22], %44 {strides = array<i32>} : memref<32x128xf32, #tpu.memory_space<vmem>>, vector<32x128xf32>,
    %c0_23 = arith.constant 0 : index
    %c0_24 = arith.constant 0 : index
    %46 = vector.load %arg12[%c0_23, %c0_24] : memref<32x128xf32, #tpu.memory_space<vmem>>, vector<32x128xf32>
    tpu.vector_store %arg12[%c0_23, %c0_24], %44 {strides = array<i32>} : memref<32x128xf32, #tpu.memory_space<vmem>>, vector<32x128xf32>,
    %47 = arith.truncf %44 : vector<32x128xf32> to vector<32x128xbf16>
    %c0_25 = arith.constant 0 : index
    %c0_26 = arith.constant 0 : index
    %48 = vector.load %arg9[%c0_25, %c0_26] : memref<128x128xbf16, #tpu.memory_space<vmem>>, vector<128x128xbf16>
    %cst_27 = arith.constant dense<0.000000e+00> : vector<32x128xf32>
    %49 = tpu.matmul %47, %48, %cst_27 {dimension_numbers = #tpu.dot_dimension_numbers<[1], [0], [0], [1], [0, 0, 1, 1], [], []>} : vector<32x128xbf16>, vector<128x128xbf16>, vector<32x128xf32> -> vector<32x128xf32>
    %c0_28 = arith.constant 0 : index
    %c0_29 = arith.constant 0 : index
    %50 = vector.load %arg10[%c0_28, %c0_29] : memref<1x128xf32, #tpu.memory_space<vmem>>, vector<1x128xf32>
    %51 = vector.broadcast %50 : vector<1x128xf32> to vector<32x128xf32>
    %52 = arith.addf %49, %51 : vector<32x128xf32>
    %c0_30 = arith.constant 0 : index
    %c0_31 = arith.constant 0 : index
    %c0_32 = arith.constant 0 : index
    %53 = vector.load %arg11[%c0_30, %c0_31, %c0_32] : memref<1x32x128xf32, #tpu.memory_space<vmem>>, vector<1x32x128xf32>
    %54 = vector.shape_cast %53 : vector<1x32x128xf32> to vector<32x128xf32>
    %55 = vector.shape_cast %52 : vector<32x128xf32> to vector<1x32x128xf32>
    tpu.vector_store %arg11[%c0_30, %c0_31, %c0_32], %55 {strides = array<i32>} : memref<1x32x128xf32, #tpu.memory_space<vmem>>, vector<1x32x128xf32>,
    return
  }
  func.func @transform_0(%arg0: i32, %arg1: i32) -> (i32, i32, i32) {
    %c0_i32 = arith.constant 0 : i32
    %c0_i32_0 = arith.constant 0 : i32
    return %arg1, %arg0, %c0_i32 : i32, i32, i32
  }
  func.func @transform_1(%arg0: i32, %arg1: i32) -> (i32, i32) {
    %c0_i32 = arith.constant 0 : i32
    %c0_i32_0 = arith.constant 0 : i32
    return %arg0, %c0_i32 : i32, i32
  }
  func.func @transform_2(%arg0: i32, %arg1: i32) -> (i32, i32) {
    %c0_i32 = arith.constant 0 : i32
    %c0_i32_0 = arith.constant 0 : i32
    %c0_i32_1 = arith.constant 0 : i32
    return %c0_i32, %c0_i32_0 : i32, i32
  }
  func.func @transform_3(%arg0: i32, %arg1: i32) -> (i32, i32) {
    %c0_i32 = arith.constant 0 : i32
    %c0_i32_0 = arith.constant 0 : i32
    %c0_i32_1 = arith.constant 0 : i32
    return %c0_i32, %c0_i32_0 : i32, i32
  }
  func.func @transform_4(%arg0: i32, %arg1: i32) -> (i32, i32) {
    %c0_i32 = arith.constant 0 : i32
    %c0_i32_0 = arith.constant 0 : i32
    %c0_i32_1 = arith.constant 0 : i32
    return %c0_i32, %c0_i32_0 : i32, i32
  }
  func.func @transform_5(%arg0: i32, %arg1: i32) -> (i32, i32) {
    %c0_i32 = arith.constant 0 : i32
    %c0_i32_0 = arith.constant 0 : i32
    %c0_i32_1 = arith.constant 0 : i32
    return %c0_i32, %c0_i32_0 : i32, i32
  }
  func.func @transform_6(%arg0: i32, %arg1: i32) -> (i32, i32) {
    %c0_i32 = arith.constant 0 : i32
    %c0_i32_0 = arith.constant 0 : i32
    %c0_i32_1 = arith.constant 0 : i32
    return %c0_i32, %c0_i32_0 : i32, i32
  }
  func.func @transform_7(%arg0: i32, %arg1: i32) -> (i32, i32) {
    %c0_i32 = arith.constant 0 : i32
    %c0_i32_0 = arith.constant 0 : i32
    %c0_i32_1 = arith.constant 0 : i32
    return %c0_i32, %c0_i32_0 : i32, i32
  }
  func.func @transform_8(%arg0: i32, %arg1: i32) -> (i32, i32) {
    %c0_i32 = arith.constant 0 : i32
    %c0_i32_0 = arith.constant 0 : i32
    %c0_i32_1 = arith.constant 0 : i32
    return %c0_i32, %c0_i32_0 : i32, i32
  }
  func.func @transform_9(%arg0: i32, %arg1: i32) -> (i32, i32, i32) {
    %c0_i32 = arith.constant 0 : i32
    %c0_i32_0 = arith.constant 0 : i32
    return %arg1, %arg0, %c0_i32 : i32, i32, i32
  }
  func.func @transform_10(%arg0: i32, %arg1: i32) -> (i32, i32) {
    %c0_i32 = arith.constant 0 : i32
    %c0_i32_0 = arith.constant 0 : i32
    return %arg0, %c0_i32 : i32, i32
  }
}

</mosaic_0001>

<bundles_post_ra>
// kernel: noisy_rnn_rollout_padded.1
= control target key start
LH: loop header
LB: loop body
LE: loop exit
PB: predicated region body
PF: predicated region fallthrough
CT: control target
= control target key end

     0   :  { %s2754_s0 = inlined_call_operand.hbm [shape: bf16[6,32,128], index: 0, kind: input, shape index: {}]   ;;  %s2755_s1 = inlined_call_operand.hbm [shape: f32[32,128], index: 1, kind: input, shape index: {}, may-alias: {1,10}]   ;;  %s2756_s2 = inlined_call_operand.vmem [shape: bf16[128,128], index: 2, kind: input, shape index: {}]   ;;  %s2757_s3 = inlined_call_operand.vmem [shape: f32[1,128], index: 3, kind: input, shape index: {}]   ;;  %s2758_s4 = inlined_call_operand.hbm [shape: bf16[128,512], index: 4, kind: input, shape index: {}]   ;;  %s2759_s5 = inlined_call_operand.hbm [shape: bf16[128,512], index: 5, kind: input, shape index: {}]   ;;  %s2760_s6 = inlined_call_operand.vmem [shape: f32[1,512], index: 6, kind: input, shape index: {}]   ;;  %s2761_s7 = inlined_call_operand.hbm [shape: bf16[128,128], index: 7, kind: input, shape index: {}]   ;;  %s2762_s8 = inlined_call_operand.vmem [shape: f32[1,128], index: 8, kind: input, shape index: {}]   ;;  %s2763_s9 = inlined_call_operand.hbm [shape: f32[6,32,128], index: 9, kind: output, shape index: {0}]   ;;  %s2764_s10 = inlined_call_operand.hbm [shape: f32[32,128], index: 10, kind: output, shape index: {1}, may-alias: {1,10}]  }
   0x1   :  { %2772 = sst [smem:[#allocation22_spill]] %s2755_s1 }
   0x2   :  { %2773 = sst [smem:[#allocation23_spill]] %s2758_s4 }
   0x3   :  { %2774 = sst [smem:[#allocation24_spill]] %s2759_s5 }
   0x4   :  { %2775 = sst [smem:[#allocation25_spill]] %s2761_s7 }
   0x5   :  { %2776 = sst [smem:[#allocation26_spill]] %s2763_s9 }
   0x6   :  { %16 = vsyncpa [#allocation4], 0 }
   0x7   :  { %18 = vsyncpa [#allocation4 + $0x1], 0 }
   0x8   :  { %19 = vsyncpa [#allocation7], 0 }
   0x9   :  { %20 = vsyncpa [#allocation10], 0 }
   0xa   :  { %21 = vsyncpa [#allocation5], 0 }
   0xb   :  { %23 = vsyncpa [#allocation5 + $0x1], 0 }
   0xc   :  { %24 = vsyncpa [#allocation14], 0  ;;  %s2421_s13 = smov 0   ;;  %s2423_s14 = smov 0  }
   0xd   :  { %s2425_s15 = smov 0   ;;  %s2427_s16 = smov 0  }
   0xe   :  { %s2429_s17 = smov 0   ;;  %s2431_s18 = smov 0  }
   0xf LB: > { %2777 = sst [smem:[#allocation20_spill]] %s2328_s13  ;;  %s1647_s19 = sadd.s32 4294967295, %s2348_s18   ;;  %s2348_s18 = sphi %s2431_s18, %s30_s18   ;;  %s2344_s17 = sphi %s2429_s17, %s2803_s17   ;;  %s2340_s16 = sphi %s2427_s16, %s2802_s16   ;;  %s2336_s15 = sphi %s2425_s15, %s2801_s15   ;;  %s2332_s14 = sphi %s2423_s14, %s2800_s14   ;;  %s2328_s13 = sphi %s2421_s13, %s2799_s13  }
  0x10   : > { %s1648_s20 = sadd.s32 4294967294, %s2348_s18   ;;  %p64_p0 = scmp.ne.s32.totalorder %s2332_s14, %s2328_s13 }
  0x11   : > { %p2455_p1 = scmp.eq.s32.totalorder %s1647_s19, 0  ;;  %p2459_p2 = scmp.eq.s32.totalorder %s1647_s19, 5 }
  0x12   : > { %p269_p3 = scmp.eq.s32.totalorder %s1648_s20, 5  ;;  %p1649_p5 = scmp.ge.s32.totalorder %s2348_s18, 1 }
  0x13   : > { %s2778_s21 = scalar_select %p2455_p1, 1, 0 }
  0x14   : > { %p2465_p4 = por %p2455_p1, %p64_p0  ;;  %p2470_p6 = por %p269_p3, %p64_p0 }
  0x15   : > { %p302_p7 = scmp.lt.s32.totalorder %s2348_s18, 7  ;;  %s2350_s26 = smov [#allocation6]  }
  0x16   : > { %s2781_s24 = scalar_select %p2470_p6, 1, 0 }
  0x17   : > { %p2475_p8 = pnand %p1649_p5, %p302_p7  ;;  %s317_s27 = sshll.u32 %s2350_s26, 4  ;;  %s318_s27 = int_to_ptr.vmem [resolvable:$true] %s317_s27 }
  0x18   : > { %2782 = sst [smem:[#allocation21_spill]] %s2781_s24  ;;  %s2351_s29 = smov [#allocation9]  }
  0x19   : > { %p1851_p9 = pneg %p2475_p8  ;;  %s349_s30 = sshll.u32 %s2351_s29, 4  ;;  %s350_s30 = int_to_ptr.vmem [resolvable:$true] %s349_s30 }
  0x1a   : > { %s2111_s11 = scalar_lea.vmem %s318_s27, 512  ;;  %p2119_p3 = scmp.lt.s32.totalorder %s318_s27, %s318_s27 }
  0x1b   : > { %p2483_p10 = pnand %p1851_p9, %p2455_p1  ;;  %p2112_p12 = scmp.ne.s32.totalorder %s318_s27, %s2111_s11 }
  0x1c   : > { %p2120_p5 = scmp.lt.s32.totalorder %s2111_s11, %s2111_s11 }
  0x1d   : > { %p2102_p11 = pneg %p2483_p10 }
  0x1e   : > { %p2121_p7 = por %p2120_p5, %p2119_p3 }
  0x1f   : > { %p2114_p13 = pnand %p2112_p12, %p2102_p11 }
  0x21   : > { %p2115_p0 = pneg %p2114_p13 }
  0x23   : > { %p2122_p6 = pnand %p2121_p7, %p2115_p0 }
  0x25   : > { %2125 = shalt.err (!%p2122_p6)
}
  0x26   : > { %s2352_s12 = smov 128   ;;  %s2353_s19 = smov 8  }
  0x27   : > { %s2785_s1 = sld [smem:[#allocation22_spill]]  ;;  %s2354_s29 = smov [#allocation8]  }
  0x28   : > { %s336_s24 = sshll.u32 %s2354_s29, 4  ;;  %s2137_s13 = scalar_lea.vmem %s350_s30, 4096  ;;  %s337_s24 = int_to_ptr.vmem [resolvable:$true] %s336_s24 }
  0x29   : > { %p2138_p9 = scmp.ne.s32.totalorder %s350_s30, %s2137_s13  ;;  %p2145_p0 = scmp.lt.s32.totalorder %s350_s30, %s350_s30 }
  0x2a   : > { %p2146_p6 = scmp.lt.s32.totalorder %s2137_s13, %s2137_s13 }
  0x2b   : > { %p2140_p12 = pnand %p2138_p9, %p2102_p11 }
  0x2c   : > { %p2147_p3 = por %p2146_p6, %p2145_p0 }
  0x2d   : > { %1854 = dma.hbm_to_vmem [thread:$0]  (!%p2483_p10), %s2785_s1, 512, %s318_s27, [#allocation7], %s2352_s12, %s2352_s12, %s2353_s19  }
  0x2e   : > { %p2141_p13 = pneg %p2140_p12 }
  0x30   : > { %p2148_p5 = pnand %p2147_p3, %p2141_p13 }
  0x32   : > { %2151 = shalt.err (!%p2148_p5)
}
  0x33   : > { %s2355_s11 = smov 256   ;;  %s2356_s9 = smov 16  }
  0x34   : > { %s2786_s5 = sld [smem:[#allocation24_spill]]  ;;  %s2163_s19 = scalar_lea.vmem %s337_s24, 4096 }
  0x35   : > { %p2164_p7 = scmp.ne.s32.totalorder %s337_s24, %s2163_s19  ;;  %p2171_p1 = scmp.lt.s32.totalorder %s337_s24, %s337_s24 }
  0x36   : > { %p2172_p0 = scmp.lt.s32.totalorder %s2163_s19, %s2163_s19 }
  0x37   : > { %p2166_p9 = pnand %p2164_p7, %p2102_p11 }
  0x38   : > { %p2173_p13 = por %p2172_p0, %p2171_p1 }
  0x39   : > { %p2167_p12 = pneg %p2166_p9 }
  0x3a   : > { %1860 = dma.hbm_to_vmem [thread:$0]  (!%p2483_p10), %s2786_s5, 4096, %s350_s30, [#allocation10], %s2355_s11, %s2355_s11, %s2356_s9  }
  0x3b   : > { %p2174_p6 = pnand %p2173_p13, %p2167_p12 }
  0x3d   : > { %2177 = shalt.err (!%p2174_p6)
}
  0x3e   : > { %s2787_s4 = sld [smem:[#allocation23_spill]]  ;;  %s2357_s30 = smov [#allocation11]  }
  0x3f   : > { %s365_s26 = sshll.u32 %s2357_s30, 4  ;;  %s366_s26 = int_to_ptr.vmem [resolvable:$true] %s365_s26 }
  0x40   : > { %s2189_s29 = scalar_lea.vmem %s366_s26, 1024  ;;  %p2197_p9 = scmp.lt.s32.totalorder %s366_s26, %s366_s26 }
  0x41   : > { %p2190_p3 = scmp.ne.s32.totalorder %s366_s26, %s2189_s29  ;;  %p2198_p1 = scmp.lt.s32.totalorder %s2189_s29, %s2189_s29 }
  0x43   : > { %p2192_p5 = pnand %p2190_p3, %p2102_p11  ;;  %p2199_p12 = por %p2198_p1, %p2197_p9 }
  0x44   : > { %1857 = dma.hbm_to_vmem [thread:$0]  (!%p2483_p10), %s2787_s4, 4096, %s337_s24, [#allocation7], %s2355_s11, %s2355_s11, %s2356_s9  }
  0x45   : > { %p2193_p7 = pneg %p2192_p5 }
  0x47   : > { %p2200_p0 = pnand %p2199_p12, %p2193_p7 }
  0x49   : > { %2203 = shalt.err (!%p2200_p0)
}
  0x4a   : > { %s2770_s27 = smov 64   ;;  %s2771_s9 = smov 4  }
  0x4b   : > { %s2788_s7 = sld [smem:[#allocation25_spill]]  ;;  %s39_s12 = sadd.s32 1, %s2344_s17 }
  0x4c   : > { %s51_s19 = sadd.s32 1, %s2336_s15  ;;  %p40_p11 = scmp.ge.s32.totalorder %s39_s12, 6 }
  0x4d   : > { %p58_p13 = scmp.ne.s32.totalorder %s2336_s15, %s2332_s14  ;;  %p59_p6 = scmp.eq.s32.totalorder %s2348_s18, 0 }
  0x4e   : > { %p1876_p3 = scmp.lt.s32.totalorder %s2348_s18, 6  ;;  %s2805_s12 = smov (%p40_p11, %s39_s12), 0 }
  0x4f   : > { %p60_p5 = por %p59_p6, %p58_p13  ;;  %p2534_p7 = por %p2459_p2, %p58_p13 }
  0x50   : > { %s46_s13 = ssub.s32 %s2344_s17, %s2805_s12  ;;  %s382_s20 = sand.u32 1, %s2336_s15  }
  0x51   : > { %1863 = dma.hbm_to_vmem [thread:$0]  (!%p2483_p10), %s2788_s7, 1024, %s366_s26, [#allocation10], %s2770_s27, %s2770_s27, %s2771_s9  }
  0x52   : > { %p49_p9 = scmp.eq.s32.totalorder %s46_s13, 0  ;;  %s1655_s30 = sshll.u32 %s382_s20, 4 }
  0x53   : > { %s1765_s26 = sshll.u32 %s2344_s17, 8  ;;  %s386_s9 = scalar_lea.vmem [#allocation3], %s1655_s30 }
  0x54   : > { %s2543_s29 = scalar_select %p49_p9, %s2336_s15, %s51_s19  }
  0x55   : > { %s394_s27 = scalar_lea.hbm %s2754_s0, %s1765_s26  ;;  %s395_s1 = sshll.u32 %s386_s9, 4  ;;  %s396_s1 = int_to_ptr.vmem [resolvable:$true] %s395_s1 }
  0x56   : > { %p2550_p10 = pnand %p1876_p3, %p60_p5  ;;  %s383_s5 = scalar_lea.sflag [#allocation4], %s382_s20 }
  0x57   : > { %s2217_s13 = scalar_lea.vmem %s396_s1, 256  ;;  %s2360_s19 = smov [#allocation3]  }
  0x58   : > { %p2206_p1 = pneg %p2550_p10  ;;  %p2218_p12 = scmp.ne.s32.totalorder %s396_s1, %s2217_s13 }
  0x59   : > { %s2222_s7 = sshll.u32 %s2360_s19, 4  ;;  %s2223_s7 = int_to_ptr.vmem [resolvable:$false] %s2222_s7 }
  0x5a   : > { %p2220_p0 = pnand %p2218_p12, %p2206_p1  ;;  %s2224_s26 = scalar_lea.vmem %s2223_s7, 512 }
  0x5b   : > { %p2225_p13 = scmp.lt.s32.totalorder %s396_s1, %s2223_s7  ;;  %p2226_p6 = scmp.lt.s32.totalorder %s2224_s26, %s2217_s13 }
  0x5c   : > { %p2221_p11 = pneg %p2220_p0 }
  0x5d   : > { %p2227_p9 = por %p2226_p6, %p2225_p13 }
  0x5f   : > { %p2228_p3 = pnand %p2227_p9, %p2221_p11 }
  0x61   : > { %2231 = shalt.err (!%p2228_p3)
}
  0x62   : > { %s2791_s9 = smov 4   ;;  %s2792_s30 = smov 64  }
  0x63   : > { %1867 = dma.hbm_to_vmem [thread:$0]  (!%p2550_p10), %s394_s27, 256, %s396_s1, %s383_s5, %s2792_s30, %s2792_s30, %s2791_s9  }
  0x64   : > { %407 = sbr.rel (%p2475_p8) target bundleno = 840 (0x348), region = 56  ;;  %s2564_s20 = sand.u32 (!%p2475_p8), 1, %s2332_s14  }
  0x65   : > { %s1659_s7 = sshll.u32 (!%p2475_p8), %s2564_s20, 4  ;;  %s410_s24 = scalar_lea.sflag (!%p2475_p8), [#allocation4], %s2564_s20 }
  0x66   : > { %s2568_s11 = scalar_lea.vmem (!%p2475_p8), [#allocation3], %s1659_s7 }
  0x69   : > { %2307 = dma.done.wait (%p2465_p4), %s410_s24, 256  }
  0x6a   : > { %2309 = vsyncadd (%p2465_p4), %s410_s24, 4294967040  ;;  %p2793_p5 = scmp.ne.s32.totalorder %s2778_s21, 0 }
  0x6c   : > { %2311 = dma.done.wait (%p2793_p5), [#allocation7], 4608  }
  0x6d   : > { %2313 = vsyncadd (%p2793_p5), [#allocation7], 4294962688 }
  0x6e   : > { %2315 = dma.done.wait (%p2793_p5), [#allocation10], 5120  }
  0x6f   : > { %2317 = vsyncadd (%p2793_p5), [#allocation10], 4294962176  ;;  %s1664_s1 = sshll.u32 %s2564_s20, 5  ;;  %p1665_p8 = scmp.ne.s32.totalorder %s2340_s16, 0 }
  0x70   : > { %s2583_s4 = scalar_lea.vmem [#allocation12], %s1664_s1 }
  0x71   : > { %474 = sbr.rel (%p1665_p8) target bundleno = 121 (0x79), region = 80 }
  0x76   : > { %v475_v0 = vld [vmem:[#allocation6] sm:$0xff]  ;;  %v476_v1 = vld [vmem:[#allocation6 + $0x8] sm:$0xff]  ;;  %v477_v2 = vld [vmem:[#allocation6 + $0x10] sm:$0xff] }
  0x77   : > { %479 = vst [vmem:[#allocation2 + $0x10] sm:$0xff] %v475_v0  ;;  %480 = vst [vmem:[#allocation2] sm:$0xff] %v476_v1  ;;  %v478_v3 = vld [vmem:[#allocation6 + $0x18] sm:$0xff] }
  0x78   : > { %481 = vst [vmem:[#allocation2 + $0x18] sm:$0xff] %v477_v2  ;;  %482 = vst [vmem:[#allocation2 + $0x8] sm:$0xff] %v478_v3 }
  0x79 PF: > { %v1946_v4 = vld [vmem:[%s2756_s2 + $0x38] sm:$0xff]   ;;  %v1947_v5 = vld [vmem:[%s2756_s2 + $0x30] sm:$0xff]   ;;  %v2361_v6 = vmov 0   ;;  %v1948_v7 = vld [vmem:[%s2756_s2 + $0x28] sm:$0xff]   ;;  %s2362_s19 = smov [#allocation13]  }
  0x7a   : > { %887 = vmatprep.mubr.bf16.mxu1 %v2361_v6  ;;  %1787 = vmatprep.subr.bf16.mxu0 %v1946_v4  ;;  %v1949_v8 = vld [vmem:[%s2756_s2 + $0x20] sm:$0xff]   ;;  %v1950_v12 = vld [vmem:[%s2756_s2 + $0x18] sm:$0xff]   ;;  %v1951_v16 = vld [vmem:[%s2756_s2 + $0x10] sm:$0xff]   ;;  %s1507_s26 = sshll.u32 %s2362_s19, 4  ;;  %s1508_s26 = int_to_ptr.vmem [resolvable:$true] %s1507_s26 }
  0x7b   : > { %1788 = vmatpush3.bf16.msra.mxu0 %v1946_v4  ;;  %v1954_v9 = vld [vmem:[%s2568_s11] sm:$0xff]   ;;  %v1952_v19 = vld [vmem:[%s2756_s2 + $0x8] sm:$0xff]   ;;  %s2232_s9 = scalar_lea.vmem %s1508_s26, 512  ;;  %p2239_p12 = scmp.lt.s32.totalorder %s1508_s26, %s1508_s26 }
  0x7c   : > { %1789 = vmatprep.subr.bf16.mxu0 %v1947_v5  ;;  %1803 = vmatprep.mubr.bf16.mxu0 %v1954_v9  ;;  %v1956_v10 = vld [vmem:[#allocation9 + $0xe4] ss:$16 sps:$4 sm:$0xff]   ;;  %v1958_v11 = vld [vmem:[#allocation9 + $0xe0] ss:$16 sps:$4 sm:$0xff]   ;;  %v1964_v25 = vld [vmem:[#allocation9 + $0xec] ss:$16 sps:$4 sm:$0xff]   ;;  %p2233_p4 = scmp.ne.s32.totalorder %s1508_s26, %s2232_s9  ;;  %p2240_p0 = scmp.lt.s32.totalorder %s2232_s9, %s2232_s9 }
  0x7d   : > { %855 = vmatprep.subr.bf16.mxu1 %v1956_v10  ;;  %v1959_v13 = vld [vmem:[#allocation9 + $0xc4] ss:$16 sps:$4 sm:$0xff]   ;;  %v1961_v14 = vld [vmem:[#allocation9 + $0xc0] ss:$16 sps:$4 sm:$0xff]   ;;  %v1955_v27 = vld [vmem:[%s2568_s11 + $0x8] sm:$0xff]  }
  0x7e   : > { %856 = vmatpush1.bf16.msra.mxu1 %v1958_v11  ;;  %v1965_v15 = vld [vmem:[#allocation9 + $0xa4] ss:$16 sps:$4 sm:$0xff]   ;;  %v1967_v17 = vld [vmem:[#allocation9 + $0xa0] ss:$16 sps:$4 sm:$0xff]   ;;  %v1962_v29 = vld [vmem:[#allocation9 + $0xe8] ss:$16 sps:$4 sm:$0xff]   ;;  %p2234_p10 = pnand %p2233_p4, %p2459_p2  ;;  %p2241_p11 = por %p2240_p0, %p2239_p12 }
  0x7f   : > { %1790 = vmatpush3.bf16.msra.mxu0 %v1947_v5  ;;  %857 = vmatprep.subr.bf16.mxu1 %v1959_v13  ;;  %v1971_v18 = vld [vmem:[#allocation9 + $0x84] ss:$16 sps:$4 sm:$0xff]   ;;  %v1973_v20 = vld [vmem:[#allocation9 + $0x80] ss:$16 sps:$4 sm:$0xff]   ;;  %v1970_v30 = vld [vmem:[#allocation9 + $0xcc] ss:$16 sps:$4 sm:$0xff]  }
  0x80   : > { %1791 = vmatprep.subr.bf16.mxu0 %v1948_v7  ;;  %v1977_v21 = vld [vmem:[#allocation9 + $0x64] ss:$16 sps:$4 sm:$0xff]   ;;  %v1979_v23 = vld [vmem:[#allocation9 + $0x60] ss:$16 sps:$4 sm:$0xff]   ;;  %v1968_v32 = vld [vmem:[#allocation9 + $0xc8] ss:$16 sps:$4 sm:$0xff]   ;;  %p2235_p1 = pneg %p2234_p10 }
  0x81   : > { %v1953_v22 = vld [vmem:[%s2756_s2] sm:$0xff]   ;;  %v1976_v34 = vld [vmem:[#allocation9 + $0xac] ss:$16 sps:$4 sm:$0xff]   ;;  %v2614_v36 = vld [vmem:[#allocation2 + $0x10] sm:$0xff] }
  0x82   : > { %858 = vmatpush1.bf16.msra.mxu1 %v1961_v14  ;;  %v1983_v24 = vld [vmem:[#allocation9 + $0x44] ss:$16 sps:$4 sm:$0xff]   ;;  %v1985_v26 = vld [vmem:[#allocation9 + $0x40] ss:$16 sps:$4 sm:$0xff]   ;;  %v1974_v39 = vld [vmem:[#allocation9 + $0xa8] ss:$16 sps:$4 sm:$0xff]   ;;  %p2242_p13 = pnand %p2241_p11, %p2235_p1 }
  0x83   : > { %1792 = vmatpush3.bf16.msra.mxu0 %v1948_v7  ;;  %859 = vmatprep.subr.bf16.mxu1 %v1965_v15  ;;  %v1989_v28 = vld [vmem:[#allocation9 + $0x24] ss:$16 sps:$4 sm:$0xff]   ;;  %v1991_v31 = vld [vmem:[#allocation9 + $0x20] ss:$16 sps:$4 sm:$0xff]   ;;  %v1982_v40 = vld [vmem:[#allocation9 + $0x8c] ss:$16 sps:$4 sm:$0xff]  }
  0x84   : > { %1793 = vmatprep.subr.bf16.mxu0 %v1949_v8  ;;  %v1995_v33 = vld [vmem:[#allocation9 + $0x4] ss:$16 sps:$4 sm:$0xff]   ;;  %v1997_v35 = vld [vmem:[#allocation9] ss:$16 sps:$4 sm:$0xff]   ;;  %v1980_v44 = vld [vmem:[#allocation9 + $0x88] ss:$16 sps:$4 sm:$0xff]  }
  0x85   : > { %v2616_v37 = vld [vmem:[#allocation2] sm:$0xff]  ;;  %v1988_v45 = vld [vmem:[#allocation9 + $0x6c] ss:$16 sps:$4 sm:$0xff]   ;;  %v1986_v47 = vld [vmem:[#allocation9 + $0x68] ss:$16 sps:$4 sm:$0xff]  }
  0x86   : > { %860 = vmatpush1.bf16.msra.mxu1 %v1967_v17  ;;  %v2006_v38 = vld [vmem:[#allocation8 + $0xe4] ss:$16 sps:$4 sm:$0xff]   ;;  %v661_v41 = vpack.c.bf16 %v2616_v37, %v2614_v36  ;;  %v2004_v42 = vld [vmem:[#allocation8 + $0xe0] ss:$16 sps:$4 sm:$0xff]   ;;  %v2621_v49 = vld [vmem:[#allocation2 + $0x18] sm:$0xff] }
  0x87   : > { %1794 = vmatpush3.bf16.msra.mxu0 %v1949_v8  ;;  %861 = vmatprep.subr.bf16.mxu1 %v1971_v18  ;;  %v2012_v43 = vld [vmem:[#allocation8 + $0xc4] ss:$16 sps:$4 sm:$0xff]   ;;  %v2010_v46 = vld [vmem:[#allocation8 + $0xc0] ss:$16 sps:$4 sm:$0xff]   ;;  %v2623_v50 = vld [vmem:[#allocation2 + $0x8] sm:$0xff] }
  0x88   : > { %1795 = vmatprep.subr.bf16.mxu0 %v1950_v12  ;;  %v2018_v48 = vld [vmem:[#allocation8 + $0xa4] ss:$16 sps:$4 sm:$0xff]   ;;  %v1994_v51 = vld [vmem:[#allocation9 + $0x4c] ss:$16 sps:$4 sm:$0xff]   ;;  %v2016_v52 = vld [vmem:[#allocation8 + $0xa0] ss:$16 sps:$4 sm:$0xff]   ;;  %v662_v54 = vpack.c.bf16 %v2623_v50, %v2621_v49 }
  0x89   : > { %v2024_v53 = vld [vmem:[#allocation8 + $0x84] ss:$16 sps:$4 sm:$0xff]   ;;  %v1992_v55 = vld [vmem:[#allocation9 + $0x48] ss:$16 sps:$4 sm:$0xff]   ;;  %v2000_v56 = vld [vmem:[#allocation9 + $0x2c] ss:$16 sps:$4 sm:$0xff]  }
  0x8a   : > { %862 = vmatpush1.bf16.msra.mxu1 %v1973_v20  ;;  %v2022_v57 = vld [vmem:[#allocation8 + $0x80] ss:$16 sps:$4 sm:$0xff]   ;;  %v2030_v58 = vld [vmem:[#allocation8 + $0x64] ss:$16 sps:$4 sm:$0xff]   ;;  %v1998_v59 = vld [vmem:[#allocation9 + $0x28] ss:$16 sps:$4 sm:$0xff]  }
  0x8b   : > { %1796 = vmatpush3.bf16.msra.mxu0 %v1950_v12  ;;  %863 = vmatprep.subr.bf16.mxu1 %v1977_v21  ;;  %v2003_v60 = vld [vmem:[#allocation9 + $0xc] ss:$16 sps:$4 sm:$0xff]   ;;  %v2028_v61 = vld [vmem:[#allocation8 + $0x60] ss:$16 sps:$4 sm:$0xff]   ;;  %v2001_v62 = vld [vmem:[#allocation9 + $0x8] ss:$16 sps:$4 sm:$0xff]  }
  0x8c   : > { %1797 = vmatprep.subr.bf16.mxu0 %v1951_v16  ;;  %v2009_v63 = vld [vmem:[#allocation8 + $0xec] ss:$16 sps:$4 sm:$0xff]   ;;  %v2007_v0 = vld [vmem:[#allocation8 + $0xe8] ss:$16 sps:$4 sm:$0xff]   ;;  %v2036_v10 = vld [vmem:[#allocation8 + $0x44] ss:$16 sps:$4 sm:$0xff]  }
  0x8d   : > { %v2015_v1 = vld [vmem:[#allocation8 + $0xcc] ss:$16 sps:$4 sm:$0xff]   ;;  %v2013_v2 = vld [vmem:[#allocation8 + $0xc8] ss:$16 sps:$4 sm:$0xff]   ;;  %v2034_v12 = vld [vmem:[#allocation8 + $0x40] ss:$16 sps:$4 sm:$0xff]  }
  0x8e   : > { %864 = vmatpush1.bf16.msra.mxu1 %v1979_v23  ;;  %v2021_v3 = vld [vmem:[#allocation8 + $0xac] ss:$16 sps:$4 sm:$0xff]   ;;  %v2019_v4 = vld [vmem:[#allocation8 + $0xa8] ss:$16 sps:$4 sm:$0xff]   ;;  %v2042_v14 = vld [vmem:[#allocation8 + $0x24] ss:$16 sps:$4 sm:$0xff]  }
  0x8f   : > { %1798 = vmatpush3.bf16.msra.mxu0 %v1951_v16  ;;  %865 = vmatprep.subr.bf16.mxu1 %v1983_v24  ;;  %v2027_v5 = vld [vmem:[#allocation8 + $0x8c] ss:$16 sps:$4 sm:$0xff]   ;;  %v2025_v7 = vld [vmem:[#allocation8 + $0x88] ss:$16 sps:$4 sm:$0xff]   ;;  %v2040_v16 = vld [vmem:[#allocation8 + $0x20] ss:$16 sps:$4 sm:$0xff]  }
  0x90   : > { %1799 = vmatprep.subr.bf16.mxu0 %v1952_v19  ;;  %v2033_v8 = vld [vmem:[#allocation8 + $0x6c] ss:$16 sps:$4 sm:$0xff]   ;;  %v2031_v9 = vld [vmem:[#allocation8 + $0x68] ss:$16 sps:$4 sm:$0xff]   ;;  %v2048_v18 = vld [vmem:[#allocation8 + $0x4] ss:$16 sps:$4 sm:$0xff]  }
  0x91   : > { %v2039_v11 = vld [vmem:[#allocation8 + $0x4c] ss:$16 sps:$4 sm:$0xff]   ;;  %v2037_v13 = vld [vmem:[#allocation8 + $0x48] ss:$16 sps:$4 sm:$0xff]   ;;  %v2046_v20 = vld [vmem:[#allocation8] ss:$16 sps:$4 sm:$0xff]  }
  0x92   : > { %866 = vmatpush1.bf16.msra.mxu1 %v1985_v26  ;;  %v2045_v15 = vld [vmem:[#allocation8 + $0x2c] ss:$16 sps:$4 sm:$0xff]   ;;  %v2043_v17 = vld [vmem:[#allocation8 + $0x28] ss:$16 sps:$4 sm:$0xff]   ;;  %v1666_v24 = vld [vmem:[%s2757_s3] ss:$0 sm:$0xff] }
  0x93   : > { %1800 = vmatpush3.bf16.msra.mxu0 %v1952_v19  ;;  %867 = vmatprep.subr.bf16.mxu1 %v1989_v28  ;;  %v2051_v19 = vld [vmem:[#allocation8 + $0xc] ss:$16 sps:$4 sm:$0xff]   ;;  %v2049_v21 = vld [vmem:[#allocation8 + $0x8] ss:$16 sps:$4 sm:$0xff]  }
  0x94   : > { %1801 = vmatprep.subr.bf16.mxu0 %v1953_v22 }
  0x96   : > { %868 = vmatpush1.bf16.msra.mxu1 %v1991_v31 }
  0x97   : > { %1802 = vmatpush3.bf16.msra.mxu0 %v1953_v22  ;;  %869 = vmatprep.subr.bf16.mxu1 %v1995_v33 }
  0x98   : > { %908 = vmatprep.subr.bf16.mxu0 %v1964_v25 }
  0x9a   : > { %1804 = vmatmul.mubr.bf16.vlgmr.msra.gmra.mxu0 %v1955_v27  ;;  %870 = vmatpush1.bf16.msra.mxu1 %v1997_v35 }
  0x9b   : > { %909 = vmatpush1.bf16.msra.mxu0 %v1962_v29  ;;  %940 = vmatprep.mubr.bf16.mxu0 %v2361_v6 }
  0x9c   : > { %910 = vmatprep.subr.bf16.mxu0 %v1970_v30  ;;  %1121 = vmatprep.subr.bf16.mxu1 %v2006_v38 }
  0x9d   : > { %888 = vmatmul.mubr.bf16.vlgmr.msra.gmra.mxu1 %v661_v41 }
  0x9e   : > { %1122 = vmatpush1.bf16.msra.mxu1 %v2004_v42  ;;  %897 = vmatprep.mubr.bf16.mxu1 %v2361_v6  ;;  %v2055_v42 = vld [vmem:[#allocation11 + $0x20] sm:$0xff]  }
  0x9f   : > { %911 = vmatpush1.bf16.msra.mxu0 %v1968_v32  ;;  %1123 = vmatprep.subr.bf16.mxu1 %v2012_v43  ;;  %v2056_v43 = vld [vmem:[#allocation11 + $0x18] sm:$0xff]  }
  0xa0   : > { %912 = vmatprep.subr.bf16.mxu0 %v1976_v34 }
  0xa2   : > { %1124 = vmatpush1.bf16.msra.mxu1 %v2010_v46 }
  0xa3   : > { %913 = vmatpush1.bf16.msra.mxu0 %v1974_v39  ;;  %1125 = vmatprep.subr.bf16.mxu1 %v2018_v48  ;;  %v2052_v39 = vld [vmem:[#allocation11 + $0x38] sm:$0xff]  }
  0xa4   : > { %914 = vmatprep.subr.bf16.mxu0 %v1982_v40  ;;  %v2053_v40 = vld [vmem:[#allocation11 + $0x30] sm:$0xff]  }
  0xa5   : > { %898 = vmatmul.mubr.bf16.gmra.mxu1 %v662_v54 }
  0xa6   : > { %1126 = vmatpush1.bf16.msra.mxu1 %v2016_v52  ;;  %1153 = vmatprep.mubr.bf16.mxu1 %v2361_v6 }
  0xa7   : > { %915 = vmatpush1.bf16.msra.mxu0 %v1980_v44  ;;  %1127 = vmatprep.subr.bf16.mxu1 %v2024_v53  ;;  %v2058_v44 = vld [vmem:[#allocation11 + $0x8] sm:$0xff]  }
  0xa8   : > { %916 = vmatprep.subr.bf16.mxu0 %v1988_v45  ;;  %v2059_v45 = vld [vmem:[#allocation11] sm:$0xff]  }
  0xaa   : > { %1128 = vmatpush1.bf16.msra.mxu1 %v2022_v57 }
  0xab   : > { %917 = vmatpush1.bf16.msra.mxu0 %v1986_v47  ;;  %1129 = vmatprep.subr.bf16.mxu1 %v2030_v58 }
  0xac   : > { %918 = vmatprep.subr.bf16.mxu0 %v1994_v51 }
  0xae   : > { %1130 = vmatpush1.bf16.msra.mxu1 %v2028_v61 }
  0xaf   : > { %919 = vmatpush1.bf16.msra.mxu0 %v1992_v55  ;;  %1131 = vmatprep.subr.bf16.mxu1 %v2036_v10  ;;  %v1229_v55 = vlaneseq }
  0xb0   : > { %920 = vmatprep.subr.bf16.mxu0 %v2000_v56 }
  0xb1   : > { %v2641_v58 = vshrl.u32 %v1229_v55, 7 }
  0xb2   : > { %1132 = vmatpush1.bf16.msra.mxu1 %v2034_v12 }
  0xb3   : > { %921 = vmatpush1.bf16.msra.mxu0 %v1998_v59  ;;  %1133 = vmatprep.subr.bf16.mxu1 %v2042_v14  ;;  %v1231_v61 = vsub.s32 0, %v2641_v58 }
  0xb4   : > { %922 = vmatprep.subr.bf16.mxu0 %v2003_v60 }
  0xb6   : > { %1134 = vmatpush1.bf16.msra.mxu1 %v2040_v16 }
  0xb7   : > { %923 = vmatpush1.bf16.msra.mxu0 %v2001_v62  ;;  %1135 = vmatprep.subr.bf16.mxu1 %v2048_v18 }
  0xb8   : > { %1174 = vmatprep.subr.bf16.mxu0 %v2009_v63  ;;  %v2651_v63 = vld [vmem:[%s2760_s6] sm:$0xf] }
  0xba   : > { %941 = vmatmul.mubr.bf16.vlgmr.msra.gmra.mxu0 %v661_v41  ;;  %1136 = vmatpush1.bf16.msra.mxu1 %v2046_v20  ;;  %v2054_v41 = vld [vmem:[#allocation11 + $0x28] sm:$0xff]  }
  0xbb   : > { %1175 = vmatpush1.bf16.msra.mxu0 %v2007_v0  ;;  %950 = vmatprep.mubr.bf16.mxu0 %v2361_v6 }
  0xbc   : > { %1176 = vmatprep.subr.bf16.mxu0 %v2015_v1  ;;  %1807 = vmatprep.subr.bf16.mxu1 %v2052_v39  ;;  %v1232_v1 = vrot.slane %v2651_v63, %v1231_v61 }
  0xbf   : > { %1177 = vmatpush1.bf16.msra.mxu0 %v2013_v2 }
  0xc0   : > { %1178 = vmatprep.subr.bf16.mxu0 %v2021_v3 }
  0xc2   : > { %951 = vmatmul.mubr.bf16.gmra.mxu0 %v662_v54 }
  0xc3   : > { %1179 = vmatpush1.bf16.msra.mxu0 %v2019_v4  ;;  %1206 = vmatprep.mubr.bf16.mxu0 %v2361_v6 }
  0xc4   : > { %1180 = vmatprep.subr.bf16.mxu0 %v2027_v5  ;;  %v1235_v5 = vsub.s32 1, %v2641_v58 }
  0xc7   : > { %1181 = vmatpush1.bf16.msra.mxu0 %v2025_v7 }
  0xc8   : > { %1182 = vmatprep.subr.bf16.mxu0 %v2033_v8 }
  0xcb   : > { %1183 = vmatpush1.bf16.msra.mxu0 %v2031_v9 }
  0xcc   : > { %1184 = vmatprep.subr.bf16.mxu0 %v2039_v11 }
  0xcf   : > { %1185 = vmatpush1.bf16.msra.mxu0 %v2037_v13  ;;  %v1236_v13 = vrot.slane %v2651_v63, %v1235_v5 }
  0xd0   : > { %1186 = vmatprep.subr.bf16.mxu0 %v2045_v15 }
  0xd3   : > { %1187 = vmatpush1.bf16.msra.mxu0 %v2043_v17 }
  0xd4   : > { %1188 = vmatprep.subr.bf16.mxu0 %v2051_v19 }
  0xd7   : > { %1189 = vmatpush1.bf16.msra.mxu0 %v2049_v21 }
 0x15a   : > { %v1805_v22 = vpop.f32.mrf.mxu0 }
 0x15b   : > { %v617_v33 = vadd.f32 %v1805_v22, %v1666_v24 }
 0x15c   : > { %v608_v23 = vpop.f32.mrf.mxu0 }
 0x15d   : > { %v609_v26 = vadd.f32 %v1666_v24, %v608_v23  ;;  %v625_v35 = vmax.f32 %v617_v33, 0.0  ;;  %v889_v46 = vpop.f32.mrf.mxu1 }
 0x15e   : > { %v1806_v25 = vpop.f32.mrf.mxu0 }
 0x15f   : > { %v623_v29 = vmax.f32 %v609_v26, 0.0  ;;  %v620_v31 = vadd.f32 %v1806_v25, %v1666_v24  ;;  %v891_v47 = vpop.f32.mrf.mxu1 }
 0x160   : > { %v611_v27 = vpop.f32.mrf.mxu0 }
 0x161   : > { %v612_v28 = vadd.f32 %v1666_v24, %v611_v27  ;;  %v626_v34 = vmax.f32 %v620_v31, 0.0  ;;  %v893_v48 = vpop.f32.mrf.mxu1 }
 0x163   : > { %v624_v30 = vmax.f32 %v612_v28, 0.0  ;;  %v628_v38 = vpack.c.bf16 %v626_v34, %v625_v35  ;;  %v895_v52 = vpop.f32.mrf.mxu1 }
 0x165   : > { %v627_v32 = vpack.c.bf16 %v624_v30, %v623_v29  ;;  %v899_v54 = vpop.f32.mrf.mxu1 }
 0x167   : > { %1154 = vmatmul.mubr.bf16.vlgmr.msra.gmra.mxu1 %v627_v32  ;;  %1207 = vmatmul.mubr.bf16.vlgmr.msra.gmra.mxu0 %v627_v32  ;;  %v901_v57 = vpop.f32.mrf.mxu1 }
 0x168   : > { %1163 = vmatprep.mubr.bf16.mxu1 %v2361_v6  ;;  %1216 = vmatprep.mubr.bf16.mxu0 %v2361_v6  ;;  %v2057_v6 = vld [vmem:[#allocation11 + $0x10] sm:$0xff]  }
 0x169   : > { %1808 = vmatpush3.bf16.msra.mxu1 %v2052_v39  ;;  %v903_v60 = vpop.f32.mrf.mxu1 }
 0x16a   : > { %1809 = vmatprep.subr.bf16.mxu1 %v2053_v40 }
 0x16b   : > { %v905_v0 = vpop.f32.mrf.mxu1 }
 0x16d   : > { %1810 = vmatpush3.bf16.msra.mxu1 %v2053_v40 }
 0x16e   : > { %1811 = vmatprep.subr.bf16.mxu1 %v2054_v41 }
 0x16f   : > { %1164 = vmatmul.mubr.bf16.gmra.mxu1 %v628_v38  ;;  %1217 = vmatmul.mubr.bf16.gmra.mxu0 %v628_v38 }
 0x171   : > { %1812 = vmatpush3.bf16.msra.mxu1 %v2054_v41 }
 0x172   : > { %1813 = vmatprep.subr.bf16.mxu1 %v2055_v42 }
 0x175   : > { %1814 = vmatpush3.bf16.msra.mxu1 %v2055_v42 }
 0x176   : > { %1815 = vmatprep.subr.bf16.mxu1 %v2056_v43 }
 0x179   : > { %1816 = vmatpush3.bf16.msra.mxu1 %v2056_v43 }
 0x17a   : > { %1817 = vmatprep.subr.bf16.mxu1 %v2057_v6  ;;  %v2635_v51 = vpop.f32.mrf.mxu0 }
 0x17c   : > { %v2637_v53 = vpop.f32.mrf.mxu0 }
 0x17d   : > { %1818 = vmatpush3.bf16.msra.mxu1 %v2057_v6 }
 0x17e   : > { %1819 = vmatprep.subr.bf16.mxu1 %v2058_v44  ;;  %v2639_v56 = vpop.f32.mrf.mxu0 }
 0x180   : > { %v2643_v59 = vpop.f32.mrf.mxu0 }
 0x181   : > { %1820 = vmatpush3.bf16.msra.mxu1 %v2058_v44 }
 0x182   : > { %1821 = vmatprep.subr.bf16.mxu1 %v2059_v45  ;;  %v2646_v62 = vpop.f32.mrf.mxu0 }
 0x184   : > { %v2654_v2 = vpop.f32.mrf.mxu0 }
 0x185   : > { %1822 = vmatpush3.bf16.msra.mxu1 %v2059_v45 }
 0x186   : > { %v2657_v9 = vpop.f32.mrf.mxu0 }
 0x188   : > { %v2660_v17 = vpop.f32.mrf.mxu0 }
 0x227   : > { %v1155_v3 = vpop.f32.mrf.mxu1  ;;  %v1208_v25 = vpop.f32.mrf.mxu0 }
 0x228   : > { %v1156_v4 = vadd.f32 %v1155_v3, %v889_v46 }
 0x229   : > { %v1157_v7 = vpop.f32.mrf.mxu1  ;;  %v1210_v34 = vpop.f32.mrf.mxu0 }
 0x22a   : > { %v1249_v8 = vadd.f32 %v1232_v1, %v1156_v4  ;;  %v1158_v12 = vadd.f32 %v1157_v7, %v891_v47  ;;  %v1209_v7 = vadd.f32 %v1208_v25, %v2635_v51 }
 0x22b   : > { %v1159_v10 = vpop.f32.mrf.mxu1  ;;  %v1212_v42 = vpop.f32.mrf.mxu0 }
 0x22c   : > { %v1741_v11 = vmul.f32 -1.442695, %v1249_v8  ;;  %v1160_v14 = vadd.f32 %v1159_v10, %v893_v48  ;;  %v1250_v20 = vadd.f32 %v1236_v13, %v1158_v12 }
 0x22d   : > { %v1161_v15 = vpop.f32.mrf.mxu1  ;;  %v1214_v46 = vpop.f32.mrf.mxu0 }
 0x22e   : > { %2060 = vpow2.f32 %v1741_v11  ;;  %v1253_v16 = vadd.f32 %v1232_v1, %v1160_v14  ;;  %v1162_v18 = vadd.f32 %v1161_v15, %v895_v52  ;;  %v1745_v29 = vmul.f32 -1.442695, %v1250_v20 }
 0x22f   : > { %v1165_v19 = vpop.f32.mrf.mxu1  ;;  %v1243_v52 = vsub.s32 3, %v2641_v58  ;;  %v1218_v55 = vpop.f32.mrf.mxu0 }
 0x230   : > { %v1742_v21 = vmul.f32 -1.442695, %v1253_v16  ;;  %v1166_v22 = vadd.f32 %v1165_v19, %v899_v54  ;;  %v1254_v26 = vadd.f32 %v1236_v13, %v1162_v18  ;;  %v1213_v19 = vadd.f32 %v1212_v42, %v2639_v56 }
 0x231   : > { %v1167_v23 = vpop.f32.mrf.mxu1  ;;  %v1220_v4 = vpop.f32.mrf.mxu0 }
 0x232   : > { %2062 = vpow2.f32 %v1742_v21  ;;  %v1257_v24 = vadd.f32 %v1232_v1, %v1166_v22  ;;  %v1168_v27 = vadd.f32 %v1167_v23, %v901_v57  ;;  %v1746_v35 = vmul.f32 -1.442695, %v1254_v26 }
 0x233   : > { %v1169_v28 = vpop.f32.mrf.mxu1  ;;  %v1239_v57 = vsub.s32 2, %v2641_v58  ;;  %v1222_v15 = vpop.f32.mrf.mxu0  ;;  %v1221_v51 = vadd.f32 %v1220_v4, %v2654_v2  ;;  %v1219_v26 = vadd.f32 %v1218_v55, %v2646_v62 }
 0x234   : > { %v1743_v30 = vmul.f32 -1.442695, %v1257_v24  ;;  %v1170_v31 = vadd.f32 %v1169_v28, %v903_v60  ;;  %v1258_v38 = vadd.f32 %v1236_v13, %v1168_v27 }
 0x235   : > { %v1171_v32 = vpop.f32.mrf.mxu1  ;;  %v1240_v8 = vrot.slane %v2651_v63, %v1239_v57  ;;  %v1224_v23 = vpop.f32.mrf.mxu0 }
 0x236   : > { %2064 = vpow2.f32 %v1743_v30  ;;  %v1261_v33 = vadd.f32 %v1232_v1, %v1170_v31  ;;  %v1172_v39 = vadd.f32 %v1171_v32, %v905_v0  ;;  %v1747_v43 = vmul.f32 -1.442695, %v1258_v38 }
 0x237   : > { %2066 = vpow2.f32 %v1745_v29  ;;  %v1211_v0 = vadd.f32 %v1210_v34, %v2637_v53  ;;  %v1244_v1 = vrot.slane %v2651_v63, %v1243_v52  ;;  %v1251_v16 = vadd.f32 %v1240_v8, %v1209_v7 }
 0x238   : > { %v1744_v40 = vmul.f32 -1.442695, %v1261_v33  ;;  %v1262_v6 = vadd.f32 %v1236_v13, %v1172_v39  ;;  %v1215_v13 = vadd.f32 %v1214_v46, %v2643_v59  ;;  %v1255_v59 = vadd.f32 %v1240_v8, %v1213_v19 }
 0x239   : > { %v1252_v12 = vadd.f32 %v1244_v1, %v1211_v0  ;;  %v1260_v28 = vadd.f32 %v1244_v1, %v1221_v51  ;;  %v1225_v29 = vadd.f32 %v1224_v23, %v2660_v17  ;;  %v1259_v31 = vadd.f32 %v1240_v8, %v1219_v26 }
 0x23a   : > { %2068 = vpow2.f32 %v1744_v40  ;;  %v1748_v47 = vmul.f32 -1.442695, %v1262_v6  ;;  %v1256_v21 = vadd.f32 %v1244_v1, %v1215_v13  ;;  %v1223_v32 = vadd.f32 %v1222_v15, %v2657_v9 }
 0x23b   : > { %v2061_v41 = vpop.eup %2060  ;;  %2070 = vpow2.f32 %v1746_v35  ;;  %v1264_v34 = vadd.f32 %v1244_v1, %v1225_v29 }
 0x23c   : > { %v1277_v44 = vadd.f32 1.0, %v2061_v41  ;;  %v1263_v38 = vadd.f32 %v1240_v8, %v1223_v32 }
 0x23e   : > { %2072 = vrcp.f32 %v1277_v44 }
 0x23f   : > { %v2063_v45 = vpop.eup %2062  ;;  %2074 = vpow2.f32 %v1747_v43 }
 0x240   : > { %v1278_v48 = vadd.f32 1.0, %v2063_v45 }
 0x242   : > { %2076 = vrcp.f32 %v1278_v48 }
 0x243   : > { %v2065_v54 = vpop.eup %2064  ;;  %2078 = vpow2.f32 %v1748_v47 }
 0x244   : > { %v1279_v60 = vadd.f32 1.0, %v2065_v54  ;;  %v2067_v61 = vpop.eup %2066 }
 0x245   : > { %v1301_v10 = vadd.f32 1.0, %v2067_v61 }
 0x246   : > { %2080 = vrcp.f32 %v1279_v60 }
 0x247   : > { %v2069_v3 = vpop.eup %2068 }
 0x248   : > { %v2071_v5 = vpop.eup %2070  ;;  %v1280_v11 = vadd.f32 1.0, %v2069_v3 }
 0x249   : > { %v1302_v14 = vadd.f32 1.0, %v2071_v5 }
 0x24a   : > { %2082 = vrcp.f32 %v1280_v11 }
 0x24b   : > { %v2073_v58 = vpop.eup %2072  ;;  %2084 = vrcp.f32 %v1301_v10 }
 0x24c   : > { %v2075_v53 = vpop.eup %2074  ;;  %v1313_v18 = vmul.f32 %v2073_v58, %v1252_v12  ;;  %2086 = vrcp.f32 %v1302_v14 }
 0x24d   : > { %v1303_v22 = vadd.f32 1.0, %v2075_v53 }
 0x24e   : > { %v1317_v20 = vadd.f32 %v1313_v18, %v1251_v16 }
 0x24f   : > { %v2077_v63 = vpop.eup %2076 }
 0x250   : > { %v2079_v24 = vpop.eup %2078  ;;  %2088 = vtanh.f32 %v1317_v20  ;;  %v1314_v25 = vmul.f32 %v2077_v63, %v1256_v21 }
 0x251   : > { %2090 = vrcp.f32 %v1303_v22  ;;  %v1304_v56 = vadd.f32 1.0, %v2079_v24 }
 0x252   : > { %v1318_v27 = vadd.f32 %v1314_v25, %v1255_v59 }
 0x253   : > { %v2081_v30 = vpop.eup %2080 }
 0x254   : > { %2092 = vtanh.f32 %v1318_v27  ;;  %v1315_v2 = vmul.f32 %v2081_v30, %v1260_v28 }
 0x255   : > { %2094 = vrcp.f32 %v1304_v56 }
 0x256   : > { %v1319_v33 = vadd.f32 %v1315_v2, %v1259_v31 }
 0x257   : > { %v2083_v35 = vpop.eup %2082 }
 0x258   : > { %2096 = vtanh.f32 %v1319_v33  ;;  %v1316_v39 = vmul.f32 %v2083_v35, %v1264_v34  ;;  %v2085_v62 = vpop.eup %2084 }
 0x259   : > { %v2087_v41 = vpop.eup %2086  ;;  %v1325_v17 = vsub.f32 1.0, %v2085_v62  ;;  %v1333_v6 = vmul.f32 %v2085_v62, %v2614_v36 }
 0x25a   : > { %v1320_v40 = vadd.f32 %v1316_v39, %v1263_v38  ;;  %v1326_v45 = vsub.f32 1.0, %v2087_v41  ;;  %v1334_v48 = vmul.f32 %v2087_v41, %v2616_v37 }
 0x25c   : > { %2098 = vtanh.f32 %v1320_v40 }
 0x25d   : > { %v2089_v42 = vpop.eup %2088 }
 0x25e   : > { %v1329_v43 = vmul.f32 %v2089_v42, %v1325_v17  ;;  %v2091_v44 = vpop.eup %2090 }
 0x25f   : > { %v1327_v55 = vsub.f32 1.0, %v2091_v44  ;;  %v1335_v0 = vmul.f32 %v2091_v44, %v2621_v49 }
 0x260   : > { %v1337_v46 = vadd.f32 %v1333_v6, %v1329_v43 }
 0x261   : > { %v2093_v9 = vpop.eup %2092 }
 0x262   : > { %v1330_v47 = vmul.f32 %v2093_v9, %v1326_v45  ;;  %1341 = vst [vmem:[#allocation2 + $0x10] sm:$0xff] %v1337_v46  ;;  %1345 = vst [vmem:[#allocation13] sm:$0xff] %v1337_v46  ;;  %v2095_v52 = vpop.eup %2094 }
 0x263   : > { %v1328_v36 = vsub.f32 1.0, %v2095_v52  ;;  %v1336_v37 = vmul.f32 %v2095_v52, %v2623_v50 }
 0x264   : > { %v1338_v54 = vadd.f32 %v1334_v48, %v1330_v47 }
 0x265   : > { %v2097_v57 = vpop.eup %2096 }
 0x266   : > { %1342 = vst [vmem:[#allocation2] sm:$0xff] %v1338_v54  ;;  %v1349_v60 = vpack.c.bf16 %v1338_v54, %v1337_v46  ;;  %1346 = vst [vmem:[#allocation13 + $0x8] sm:$0xff] %v1338_v54  ;;  %v1331_v61 = vmul.f32 %v2097_v57, %v1327_v55 }
 0x268   : > { %1823 = vmatprep.mubr.bf16.mxu1 %v1349_v60  ;;  %v1339_v1 = vadd.f32 %v1335_v0, %v1331_v61 }
 0x269   : > { %v2099_v3 = vpop.eup %2098 }
 0x26a   : > { %v1332_v4 = vmul.f32 %v2099_v3, %v1328_v36  ;;  %1343 = vst [vmem:[#allocation2 + $0x18] sm:$0xff] %v1339_v1  ;;  %1347 = vst [vmem:[#allocation13 + $0x10] sm:$0xff] %v1339_v1 }
 0x26c   : > { %v1340_v5 = vadd.f32 %v1336_v37, %v1332_v4 }
 0x26e   : > { %1344 = vst [vmem:[#allocation2 + $0x8] sm:$0xff] %v1340_v5  ;;  %v1350_v7 = vpack.c.bf16 %v1340_v5, %v1339_v1  ;;  %1348 = vst [vmem:[#allocation13 + $0x18] sm:$0xff] %v1340_v5 }
 0x270   : > { %1824 = vmatmul.mubr.bf16.vlgmr.msra.gmra.mxu1 %v1350_v7 }
 0x271   : > { %2245 = shalt.err (!%p2242_p13)
}
 0x272   : > { %s2363_s30 = smov 128   ;;  %s2364_s7 = smov 8   ;;  %v1749_v49 = vld [vmem:[%s2762_s8] ss:$0 sm:$0xff] }
 0x273   : > { %1847 = dma.vmem_to_hbm [thread:$0]  (%p2459_p2), %s1508_s26, 512, %s2764_s10, [#allocation14], %s2363_s30, %s2363_s30, %s2364_s7  }
 0x274   : > { %s1766_s21 = sshll.u32 %s2340_s16, 9  ;;  %s1491_s11 = sshll.u32 %s2583_s4, 4  ;;  %s2701_s11 = int_to_ptr.vmem [resolvable:$true] %s1491_s11 }
 0x275   : > { %s2794_s13 = sld [smem:[#allocation26_spill]]  ;;  %s1476_s9 = scalar_lea.sflag [#allocation5], %s2564_s20 }
 0x276   : > { %s2256_s24 = scalar_lea.vmem %s2701_s11, 512  ;;  %s2365_s16 = smov [#allocation12]  }
 0x277   : > { %p2257_p6 = scmp.ne.s32.totalorder %s2701_s11, %s2256_s24  ;;  %s2260_s1 = sshll.u32 %s2365_s16, 4  ;;  %s2261_s1 = int_to_ptr.vmem [resolvable:$false] %s2260_s1 }
 0x278   : > { %s2262_s5 = scalar_lea.vmem %s2261_s1, 1024  ;;  %p2263_p5 = scmp.lt.s32.totalorder %s2701_s11, %s2261_s1 }
 0x279   : > { %p2258_p9 = pnand %p2257_p6, %p2534_p7  ;;  %p2264_p8 = scmp.lt.s32.totalorder %s2262_s5, %s2256_s24 }
 0x27b   : > { %s2795_s19 = smov %s2794_s13  ;;  %s2699_s26 = scalar_lea.hbm %s2794_s13, %s1766_s21 }
 0x27c   : > { %p2259_p3 = pneg %p2258_p9  ;;  %p2265_p4 = por %p2264_p8, %p2263_p5 }
 0x27e   : > { %p2266_p10 = pnand %p2265_p4, %p2259_p3 }
 0x330   : > { %v1825_v50 = vpop.f32.mrf.mxu1 }
 0x331   : > { %v1465_v8 = vadd.f32 %v1825_v50, %v1749_v49 }
 0x332   : > { %v1456_v10 = vpop.f32.mrf.mxu1 }
 0x333   : > { %1473 = vst [vmem:[%s2583_s4 + $0x10] sm:$0xff] %v1465_v8  ;;  %v1457_v11 = vadd.f32 %v1749_v49, %v1456_v10 }
 0x334   : > { %v1826_v12 = vpop.f32.mrf.mxu1 }
 0x335   : > { %1471 = vst [vmem:[%s2583_s4] sm:$0xff] %v1457_v11  ;;  %v1468_v13 = vadd.f32 %v1826_v12, %v1749_v49 }
 0x336   : > { %v1459_v58 = vpop.f32.mrf.mxu1 }
 0x337   : > { %1474 = vst [vmem:[%s2583_s4 + $0x18] sm:$0xff] %v1468_v13  ;;  %v1460_v14 = vadd.f32 %v1749_v49, %v1459_v58 }
 0x339   : > { %1472 = vst [vmem:[%s2583_s4 + $0x8] sm:$0xff] %v1460_v14 }
 0x33a   : > { %2269 = shalt.err (!%p2266_p10)
}
 0x33b   : > { %s2270_s4 = scalar_lea.hbm %s2699_s26, 512  ;;  %s2274_s21 = scalar_lea.hbm %s2795_s19, 3072 }
 0x33c   : > { %p2271_p1 = scmp.ne.s32.totalorder %s2699_s26, %s2270_s4  ;;  %p2275_p11 = scmp.lt.s32.totalorder %s2699_s26, %s2795_s19 }
 0x33d   : > { %p2276_p13 = scmp.lt.s32.totalorder %s2274_s21, %s2270_s4 }
 0x33e   : > { %p2272_p12 = pnand %p2271_p1, %p2534_p7 }
 0x33f   : > { %p2277_p6 = por %p2276_p13, %p2275_p11 }
 0x340   : > { %p2273_p0 = pneg %p2272_p12 }
 0x342   : > { %p2278_p9 = pnand %p2277_p6, %p2273_p0 }
 0x344   : > { %2281 = shalt.err (!%p2278_p9)
}
 0x345   : > { %1845 = dma.vmem_to_hbm [thread:$0]  (%p2534_p7), %s2701_s11, 512, %s2699_s26, %s1476_s9, %s2363_s30, %s2363_s30, %s2364_s7  }
 0x346   : > { %2319 = dma.done.wait (%p2459_p2), [#allocation14], 512  }
 0x347   : > { %2321 = vsyncadd (%p2459_p2), [#allocation14], 4294966784 }
 0x348 PF: > { %s2796_s13 = sld [smem:[#allocation20_spill]]  ;;  %p1883_p3 = scmp.ge.s32.totalorder %s2348_s18, 2 }
 0x349   : > { %s2797_s24 = sld [smem:[#allocation21_spill]] }
 0x34e   : > { %s1526_s16 = sand.u32 1, %s2796_s13  }
 0x34f   : > { %p2798_p5 = scmp.ne.s32.totalorder %s2797_s24, 0  ;;  %s1527_s28 = scalar_lea.sflag [#allocation5], %s1526_s16 }
 0x351   : > { %p1869_p8 = pnand %p1883_p3, %p2798_p5 }
 0x353   : > { %p1870_p4 = pneg %p1869_p8 }
 0x355   : > { %2323 = dma.done.wait (%p1870_p4), %s1527_s28, 512  }
 0x356   : > { %2325 = vsyncadd (%p1870_p4), %s1527_s28, 4294966784  ;;  %s30_s18 = sadd.s32 1, %s2348_s18   ;;  %s2799_s13 = smov %s2332_s14 }
 0x357   : > { %p27_p7 = scmp.ge.s32.totalorder %s30_s18, 8   ;;  %s2800_s14 = smov %s2336_s15 }
 0x358   : > { %s2801_s15 = smov %s2543_s29  ;;  %s2802_s16 = smov %s2344_s17 }
 0x359   : > { %s2803_s17 = smov %s2805_s12  ;;  %29 = sbr.rel (!%p27_p7) target bundleno = 15 (0xf), region = 131 }
 0x35e   :  { %1532 = vsyncpa [#allocation4], 1 }
 0x35f   :  { %1534 = vsyncpa [#allocation4 + $0x1], 1 }
 0x360   :  { %1535 = vsyncpa [#allocation7], 1 }
 0x361   :  { %1536 = vsyncpa [#allocation10], 1 }
 0x362   :  { %1537 = vsyncpa [#allocation5], 1 }
 0x363   :  { %1539 = vsyncpa [#allocation5 + $0x1], 1 }
 0x364   :  { %1540 = vsyncpa [#allocation14], 1 }

</bundles_post_ra>
